<compile_context>
chip_gen: v5e
topology: v5e:2x2
jax: 0.10.0
libtpu: 0.0.40
codegen_flags: <defaults>
</compile_context>

<pallas_src>
import functools
import math

import jax
import jax.numpy as jnp
from jax.experimental import pallas as pl
from jax.experimental.pallas import tpu as pltpu


_VMEM_LIMIT = 32 * 1024 * 1024        # guardrail sized for v7x's 64 MiB VMEM
_FULLK_BLOCK_BYTES = 4 * 1024 * 1024  # per-operand budget for single-step K


# ---------------------------------------------------------------------------
# f32 activation epilogues
# ---------------------------------------------------------------------------
def _apply_act(acc, act):
    if act == "leaky":
        return jnp.where(acc >= 0.0, acc, 0.2 * acc)
    if act == "sigmoid":
        # exact, numerically stable sigmoid (output is tiny -> exact divide)
        z = jnp.exp(-jnp.abs(acc))
        return jnp.where(acc >= 0.0, 1.0, z) / (1.0 + z)
    return acc


# ---------------------------------------------------------------------------
# Fused matmul + bias + activation kernels
# ---------------------------------------------------------------------------
def _mm_fullk_kernel(x_ref, w_ref, b_ref, o_ref, *, act):
    # Whole K in one step: accumulate in registers, write the output once.
    acc = jnp.dot(x_ref[...], w_ref[...], preferred_element_type=jnp.float32)
    o_ref[...] = _apply_act(acc + b_ref[...], act).astype(o_ref.dtype)


def _mm_ktiled_kernel(x_ref, w_ref, b_ref, o_ref, acc_ref, *, act):
    # Fallback for K too large for a single step: f32 scratch accumulator.
    @pl.when(pl.program_id(2) == 0)
    def _init():
        acc_ref[...] = jnp.zeros_like(acc_ref)

    acc_ref[...] += jnp.dot(x_ref[...], w_ref[...],
                            preferred_element_type=jnp.float32)

    @pl.when(pl.program_id(2) == pl.num_programs(2) - 1)
    def _finalize():
        o_ref[...] = _apply_act(acc_ref[...] + b_ref[...], act).astype(o_ref.dtype)


def _pick(dim, candidates):
    for t in candidates:
        if t <= dim and dim % t == 0:
            return t
    return dim


def matmul_bias_act(x, w, b, act="none", out_dtype=jnp.bfloat16):
    """x:[M,K] @ w:[K,N] + b:[N] with fused activation; bf16 MXU / f32 epilogue."""
    M, K = x.shape
    Kw, N = w.shape
    assert K == Kw
    x = x.astype(jnp.bfloat16)
    w = w.astype(jnp.bfloat16)
    b2 = b.reshape(1, N).astype(jnp.float32)

    tm = _pick(M, (256, 128, 64, 32, 16, 8))
    tn = _pick(N, (512, 256, 128))

    # Prefer a single K step (no accumulator scratch, one grid step along K)
    # whenever the bf16 operand blocks stay small - every matmul in this
    # network takes this path.
    if tm * K * 2 <= _FULLK_BLOCK_BYTES and K * tn * 2 <= _FULLK_BLOCK_BYTES:
        return pl.pallas_call(
            functools.partial(_mm_fullk_kernel, act=act),
            out_shape=jax.ShapeDtypeStruct((M, N), out_dtype),
            grid=(M // tm, N // tn),
            in_specs=[
                pl.BlockSpec((tm, K), lambda i, j: (i, 0)),
                pl.BlockSpec((K, tn), lambda i, j: (0, j)),
                pl.BlockSpec((1, tn), lambda i, j: (0, j)),
            ],
            out_specs=pl.BlockSpec((tm, tn), lambda i, j: (i, j)),
            compiler_params=pltpu.CompilerParams(
                dimension_semantics=("parallel", "parallel"),
                vmem_limit_bytes=_VMEM_LIMIT,
            ),
        )(x, w, b2)

    tk = _pick(K, (2048, 1024, 512, 256, 128))
    return pl.pallas_call(
        functools.partial(_mm_ktiled_kernel, act=act),
        out_shape=jax.ShapeDtypeStruct((M, N), out_dtype),
        grid=(M // tm, N // tn, K // tk),
        in_specs=[
            pl.BlockSpec((tm, tk), lambda i, j, k: (i, k)),
            pl.BlockSpec((tk, tn), lambda i, j, k: (k, j)),
            pl.BlockSpec((1, tn), lambda i, j, k: (0, j)),
        ],
        out_specs=pl.BlockSpec((tm, tn), lambda i, j, k: (i, j)),
        scratch_shapes=[pltpu.VMEM((tm, tn), jnp.float32)],
        compiler_params=pltpu.CompilerParams(
            dimension_semantics=("parallel", "parallel", "arbitrary"),
            vmem_limit_bytes=_VMEM_LIMIT,
        ),
    )(x, w, b2)


# ---------------------------------------------------------------------------
# Fused 3x3 conv (+ LeakyReLU) kernel: in-kernel im2col over 9 taps
# ---------------------------------------------------------------------------
def _conv3x3_kernel(x_ref, w_ref, b_ref, o_ref, acc_ref, *, H, W):
    # x_ref: [1, H+2, W+2, C]  one batch element, zero-padded NHWC (bf16)
    # w_ref: [9, C, O]         per-tap matmul weights (equal_lr pre-scaled)
    # acc_ref: [H*W, O] f32 VMEM scratch accumulator (VMEM-local, no HBM RMW).
    for kh in range(3):
        for kw in range(3):
            patch = x_ref[0, kh:kh + H, kw:kw + W, :]           # [H, W, C]
            contrib = jnp.dot(patch.reshape(H * W, patch.shape[-1]),
                              w_ref[kh * 3 + kw],
                              preferred_element_type=jnp.float32)
            if kh == 0 and kw == 0:
                acc_ref[...] = contrib
            else:
                acc_ref[...] += contrib
    acc = acc_ref[...] + b_ref[...]
    o_ref[0] = jnp.where(acc >= 0.0, acc, 0.2 * acc).astype(o_ref.dtype)


def fused_conv3x3_lrelu(x_nhwc, w9, b):
    """EqualConv2d(3x3, pad=1) + LeakyReLU(0.2): one pallas_call per stage."""
    B, H, W, C = x_nhwc.shape
    _, Cw, O = w9.shape
    assert C == Cw
    xp = jnp.pad(x_nhwc.astype(jnp.bfloat16), ((0, 0), (1, 1), (1, 1), (0, 0)))
    out = pl.pallas_call(
        functools.partial(_conv3x3_kernel, H=H, W=W),
        out_shape=jax.ShapeDtypeStruct((B, H * W, O), jnp.bfloat16),
        grid=(B,),
        in_specs=[
            pl.BlockSpec((1, H + 2, W + 2, C), lambda i: (i, 0, 0, 0)),
            pl.BlockSpec((9, C, O), lambda i: (0, 0, 0)),
            pl.BlockSpec((1, O), lambda i: (0, 0)),
        ],
        out_specs=pl.BlockSpec((1, H * W, O), lambda i: (i, 0, 0)),
        scratch_shapes=[pltpu.VMEM((H * W, O), jnp.float32)],
        compiler_params=pltpu.CompilerParams(
            dimension_semantics=("parallel",),   # batch -> both v7x TensorCores
            vmem_limit_bytes=_VMEM_LIMIT,
        ),
    )(xp, w9.astype(jnp.bfloat16), b.reshape(1, O).astype(jnp.float32))
    return out.reshape(B, H, W, O)


# ---------------------------------------------------------------------------
# NHWC helpers
# ---------------------------------------------------------------------------
def conv1x1(x_nhwc, w_mat, b):
    """Pointwise conv: x:[B,H,W,C] @ w:[C,O] + b (no activation)."""
    B, H, W, C = x_nhwc.shape
    out = matmul_bias_act(x_nhwc.reshape(B * H * W, C), w_mat, b,
                          act="none", out_dtype=jnp.bfloat16)
    return out.reshape(B, H, W, -1)


def avg_pool2_nhwc(x):
    # TODO(synk): fuse into the conv kernel epilogue (strided sublane adds).
    B, H, W, C = x.shape
    pooled = (x.reshape(B, H // 2, 2, W // 2, 2, C)
               .astype(jnp.float32).mean(axis=(2, 4)))
    return pooled.astype(x.dtype)


# ---------------------------------------------------------------------------
# Discriminator parameters + forward
# ---------------------------------------------------------------------------
PROG_CH = [(8, 16), (16, 32), (32, 64), (64, 128), (128, 256), (257, 512)]
FROM_GRAY_OUT = [8, 16, 32, 64, 128, 256, 512]
N_LAYER = len(PROG_CH)


def init_params(key, in_ch):
    keys = iter(jax.random.split(key, 64))

    def nrm(shape, scale=1.0):
        return scale * jax.random.normal(next(keys), shape, jnp.float32)

    # plain nn.Conv2d(1x1) weights, PyTorch layout (O, C)
    fg_w = [nrm((o, in_ch), 0.05) for o in FROM_GRAY_OUT]
    fg_b = [nrm((o,), 0.01) for o in FROM_GRAY_OUT]
    init_w = nrm((512, in_ch), 0.05)
    init_b = nrm((512,), 0.01)

    # EqualConv2d(3x3): weight ~ N(0,1), bias = 0; equal_lr scale sqrt(2/(9*cin))
    prog_w9, prog_b, fold_w9 = [], [], []
    for k, (ci, co) in enumerate(PROG_CH):
        w = nrm((co, ci, 3, 3), 1.0) * math.sqrt(2.0 / (ci * 9))
        w9 = jnp.transpose(w, (2, 3, 1, 0)).reshape(9, ci, co)   # [tap, cin, cout]
        prog_w9.append(w9.astype(jnp.bfloat16))
        prog_b.append(jnp.zeros((co,), jnp.float32))
        if k < N_LAYER - 1:
            # Fold from_gray[k] (1x1 conv + bias) into the 3x3 taps; the bias
            # rides on an appended ones-channel so zero padding stays exact.
            wf = jnp.einsum("mi,tmo->tio", fg_w[k], w9)            # [9, in_ch, co]
            bf = jnp.einsum("m,tmo->to", fg_b[k], w9)[:, None, :]  # [9, 1, co]
            fold_w9.append(jnp.concatenate([wf, bf], axis=1).astype(jnp.bfloat16))
        else:
            fold_w9.append(None)   # expand==1 path keeps the unfused 1x1 conv

    # final Linear(8192, 1); PyTorch flattens NCHW as (c=512, h=4, w=4)
    lin_w = nrm((1, 8192), 0.01)
    lin_b = jnp.zeros((1,), jnp.float32)
    lin_w_r = lin_w.reshape(512, 4, 4)
    # our flatten is NHWC (h,w,c) -> fold the permutation into the weight
    lin_w_mat = jnp.transpose(lin_w_r, (1, 2, 0)).reshape(8192, 1)

    # expand==0 path: fold init_conv (1x1) into the Linear -> [in_ch*4*4, 1]
    init_lin_w = jnp.einsum("chw,ci->hwi", lin_w_r, init_w).reshape(4 * 4 * in_ch, 1)
    init_lin_b = (lin_b + jnp.einsum("chw,c->", lin_w_r, init_b)).reshape(1)

    return {
        "from_gray_w": [w.T.astype(jnp.bfloat16) for w in fg_w],  # matmul-ready (C, O)
        "from_gray_b": fg_b,
        "prog_w9": prog_w9, "prog_b": prog_b, "fold_w9": fold_w9,
        "lin_w": lin_w_mat.astype(jnp.bfloat16), "lin_b": lin_b,
        "init_lin_w": init_lin_w.astype(jnp.bfloat16), "init_lin_b": init_lin_b,
    }


def discriminator_forward(params, x, expand=0, alpha=-1):
    b = x.shape[0]
    # single NCHW -> NHWC layout change at the module boundary; bf16 onwards.
    x_nhwc = jnp.transpose(x, (0, 2, 3, 1)).astype(jnp.bfloat16)

    if expand == 0:
        # init_conv (1x1) folded into the Linear: one tiny fused matmul+sigmoid.
        flat = x_nhwc.reshape(b, -1)                  # (h, w, c) order
        return matmul_bias_act(flat, params["init_lin_w"], params["init_lin_b"],
                               act="sigmoid", out_dtype=jnp.float32)

    out = None
    for i in range(expand, 0, -1):
        index = N_LAYER - i
        if i == expand and index < N_LAYER - 1:
            # from_gray 1x1 folded into this stage's 3x3 conv (ones-channel fold)
            ones = jnp.ones(x_nhwc.shape[:-1] + (1,), x_nhwc.dtype)
            feat = jnp.concatenate([x_nhwc, ones], axis=-1)
            out = fused_conv3x3_lrelu(feat, params["fold_w9"][index],
                                      params["prog_b"][index])
        else:
            if i == expand:   # expand == 1: std-concat intervenes, keep 1x1 unfused
                out = conv1x1(x_nhwc, params["from_gray_w"][index],
                              params["from_gray_b"][index])
            if i == 1:
                # minibatch stddev of the network input (torch .std(0): unbiased)
                mean_std = jnp.std(x.astype(jnp.float32), axis=0, ddof=1).mean()
                # 8x8 broadcast matches the reference's hard-coded expand(b,1,8,8)
                ms = jnp.broadcast_to(mean_std, (b, 8, 8, 1)).astype(out.dtype)
                out = jnp.concatenate([out, ms], axis=-1)
            out = fused_conv3x3_lrelu(out, params["prog_w9"][index],
                                      params["prog_b"][index])
        out = avg_pool2_nhwc(out)
        if i == expand and 0 <= alpha < 1:
            skip = avg_pool2_nhwc(x_nhwc)
            skip = conv1x1(skip, params["from_gray_w"][index + 1],
                           params["from_gray_b"][index + 1])
            out = ((1 - alpha) * skip.astype(jnp.float32)
                   + alpha * out.astype(jnp.float32)).astype(jnp.bfloat16)

    flat = out.reshape(b, -1)                         # [B, 8192] in (h,w,c) order
    return matmul_bias_act(flat, params["lin_w"], params["lin_b"],
                           act="sigmoid", out_dtype=jnp.float32)


# ---------------------------------------------------------------------------
if __name__ == "__main__":
    key = jax.random.PRNGKey(0)
    k_params, k_x0, k_x2 = jax.random.split(key, 3)

    in_ch = 4
    params = init_params(k_params, in_ch)

    fwd0 = jax.jit(functools.partial(discriminator_forward, expand=0))
    fwd2 = jax.jit(functools.partial(discriminator_forward, expand=2, alpha=0.5))

    # expand == 0 path: Linear expects 8192 = 512*4*4 features -> 4x4 input
    x0 = jax.random.normal(k_x0, (2, in_ch, 4, 4), jnp.float32)
    out0 = fwd0(params, x0)

    # expand == 2 path (with alpha fade-in): final stage is 8x8 -> input is 16x16
    x2 = jax.random.normal(k_x2, (2, in_ch, 16, 16), jnp.float32)
    out2 = fwd2(params, x2)

    out0, out2 = jax.block_until_ready((out0, out2))
    assert out0.shape == (2, 1) and out2.shape == (2, 1)
    assert bool(jnp.all(jnp.isfinite(out0))) and bool(jnp.all(jnp.isfinite(out2)))
    assert bool(jnp.all((out0 > 0) & (out0 < 1))) and bool(jnp.all((out2 > 0) & (out2 < 1)))
    print("KERNEL_OK")
</pallas_src>

<mosaic_0001>
module attributes {stable_mosaic.version = 11 : i64} {
  func.func @_mm_fullk_kernel(%arg0: i32, %arg1: i32, %arg2: memref<2x64xbf16, #tpu.memory_space<vmem>>, %arg3: memref<64x1xbf16, #tpu.memory_space<vmem>>, %arg4: memref<1x1xf32, #tpu.memory_space<vmem>>, %arg5: memref<2x1xf32, #tpu.memory_space<vmem>>) attributes {dimension_semantics = [#tpu.dimension_semantics<parallel>, #tpu.dimension_semantics<parallel>], iteration_bounds = array<i64: 1, 1>, scalar_prefetch = 0 : i64, scratch_operands = 0 : i64, tpu.core_type = #tpu.core_type<tc>, window_params = [{transform_indices = @transform_0, window_bounds = array<i64: 2, 64>}, {transform_indices = @transform_1, window_bounds = array<i64: 64, 1>}, {transform_indices = @transform_2, window_bounds = array<i64: 1, 1>}, {transform_indices = @transform_3, window_bounds = array<i64: 2, 1>}]} {
    %c0 = arith.constant 0 : index
    %c0_0 = arith.constant 0 : index
    %0 = vector.load %arg2[%c0, %c0_0] : memref<2x64xbf16, #tpu.memory_space<vmem>>, vector<2x64xbf16>
    %c0_1 = arith.constant 0 : index
    %c0_2 = arith.constant 0 : index
    %1 = vector.load %arg3[%c0_1, %c0_2] : memref<64x1xbf16, #tpu.memory_space<vmem>>, vector<64x1xbf16>
    %cst = arith.constant dense<0.000000e+00> : vector<2x1xf32>
    %2 = tpu.matmul %0, %1, %cst {dimension_numbers = #tpu.dot_dimension_numbers<[1], [0], [0], [1], [0, 0, 1, 1], [], []>} : vector<2x64xbf16>, vector<64x1xbf16>, vector<2x1xf32> -> vector<2x1xf32>
    %c0_3 = arith.constant 0 : index
    %c0_4 = arith.constant 0 : index
    %3 = vector.load %arg4[%c0_3, %c0_4] : memref<1x1xf32, #tpu.memory_space<vmem>>, vector<1x1xf32>
    %4 = vector.broadcast %3 : vector<1x1xf32> to vector<2x1xf32>
    %5 = arith.addf %2, %4 : vector<2x1xf32>
    %6 = math.absf %5 : vector<2x1xf32>
    %cst_5 = arith.constant 0.000000e+00 : f32
    %7 = vector.broadcast %cst_5 : f32 to vector<2x1xf32>
    %8 = arith.subf %7, %6 : vector<2x1xf32>
    %9 = math.exp %8 : vector<2x1xf32>
    %cst_6 = arith.constant 0.000000e+00 : f32
    %10 = vector.broadcast %cst_6 : f32 to vector<2x1xf32>
    %11 = arith.cmpf oge, %5, %10 : vector<2x1xf32>
    %cst_7 = arith.constant 1.000000e+00 : f32
    %12 = vector.broadcast %cst_7 : f32 to vector<2x1xf32>
    %13 = arith.select %11, %12, %9 : vector<2x1xi1>, vector<2x1xf32>
    %cst_8 = arith.constant 1.000000e+00 : f32
    %14 = vector.broadcast %cst_8 : f32 to vector<2x1xf32>
    %15 = arith.addf %14, %9 : vector<2x1xf32>
    %16 = arith.divf %13, %15 : vector<2x1xf32>
    %c0_9 = arith.constant 0 : index
    %c0_10 = arith.constant 0 : index
    %17 = vector.load %arg5[%c0_9, %c0_10] : memref<2x1xf32, #tpu.memory_space<vmem>>, vector<2x1xf32>
    tpu.vector_store %arg5[%c0_9, %c0_10], %16 {strides = array<i32>} : memref<2x1xf32, #tpu.memory_space<vmem>>, vector<2x1xf32>,
    return
  }
  func.func @transform_0(%arg0: i32, %arg1: i32) -> (i32, i32) {
    %c0_i32 = arith.constant 0 : i32
    %c0_i32_0 = arith.constant 0 : i32
    return %arg0, %c0_i32 : i32, i32
  }
  func.func @transform_1(%arg0: i32, %arg1: i32) -> (i32, i32) {
    %c0_i32 = arith.constant 0 : i32
    %c0_i32_0 = arith.constant 0 : i32
    return %c0_i32, %arg1 : i32, i32
  }
  func.func @transform_2(%arg0: i32, %arg1: i32) -> (i32, i32) {
    %c0_i32 = arith.constant 0 : i32
    %c0_i32_0 = arith.constant 0 : i32
    return %c0_i32, %arg1 : i32, i32
  }
  func.func @transform_3(%arg0: i32, %arg1: i32) -> (i32, i32) {
    %c0_i32 = arith.constant 0 : i32
    return %arg0, %arg1 : i32, i32
  }
}

</mosaic_0001>

<bundles_post_ra>
// kernel: discriminator_forward.1
= control target key start
LH: loop header
LB: loop body
LE: loop exit
PB: predicated region body
PF: predicated region fallthrough
CT: control target
= control target key end

     0   :  { %vm54_vm0 = vcmask 523264   ;;  %vm93_vm6 = vcmask 1024   ;;  %s166_s1 = inlined_call_operand.vmem [shape: bf16[64,1], index: 1, kind: input, shape index: {}]   ;;  %s167_s2 = inlined_call_operand.<no memory space> [shape: f32[1,1], index: 2, kind: input, shape index: {}]   ;;  %s168_s0 = inlined_call_operand.vmem [shape: bf16[2,64], index: 0, kind: input, shape index: {}]   ;;  %s169_s3 = inlined_call_operand.vmem [shape: f32[2,1], index: 3, kind: output, shape index: {}]  }
   0x1   :  { %v119_v0 = vld [vmem:[%s166_s1 + $0x18] sm:$0xff]  ;;  %v8_v1 = vstv %s167_s2  ;;  %v118_v2 = vld [vmem:[%s166_s1 + $0x10] sm:$0xff]  ;;  %v117_v3 = vld [vmem:[%s166_s1 + $0x8] sm:$0xff] }
   0x2   :  { %9 = vst [vmem:[#allocation2] sm:$0x1] %v8_v1  ;;  %62 = vmatpush.bf16.msra.mxu0 %v119_v0  ;;  %v116_v4 = vld [vmem:[%s166_s1] sm:$0xff] }
   0x3   :  { %v17_v5 = vld [vmem:[%s168_s0] sm:$0x1] }
   0x6   :  { %63 = vmatpush.bf16.msra.mxu0 %v118_v2 }
   0x9   :  { %v120_v6 = vld [vmem:[#allocation2] ss:$0 sm:$0xff] }
   0xa   :  { %64 = vmatpush.bf16.msra.mxu0 %v117_v3 }
   0xe   :  { %65 = vmatpush.bf16.msra.mxu0 %v116_v4 }
  0x11   :  { %115 = vmatmul.msk.bf16.vlgmr.msra.gmra.mxu0 %vm54_vm0, %v17_v5 }
  0x8e   :  { %v67_v7 = vpop.f32.mrf.mxu0 }
  0x8f   :  { %v68_v8 = vadd.f32 %v120_v6, %v67_v7 }
  0x91   :  { %v71_v9 = vand.u32 2147483647, %v68_v8  ;;  %vm75_vm4 = vcmp.ge.f32.partialorder %v68_v8, 0.0 }
  0x93   :  { %v72_v10 = vsub.f32 0.0, %v71_v9 }
  0x95   :  { %v73_v11 = vmul.f32 1.442695, %v72_v10 }
  0x96   :  { %v69_v12 = vpop.f32.mrf.mxu0 }
  0x97   :  { %121 = vpow2.f32 %v73_v11 }
  0x9d   :  { %v122_v13 = vpop.eup %121 }
  0x9e   :  { %v77_v14 = vadd.f32 1.0, %v122_v13  ;;  %v76_v24 = vsel %vm75_vm4, 1.0, %v122_v13 }
  0xa0   :  { %123 = vrcp.f32 %v77_v14  ;;  %v89_v18 = vand.u32 2147483648, %v77_v14  ;;  %v87_v20 = vand.u32 2147483647, %v77_v14  ;;  %vm83_vm2 = vweird.f32 %v77_v14 }
  0xa2   :  { %v90_v22 = vor.u32 1.1754944e-38, %v89_v18  ;;  %vm88_vm5 = vcmp.eq.f32.partialorder %v87_v20, 8.507059e+37 }
  0xa6   :  { %v124_v15 = vpop.eup %123 }
  0xa7   :  { %v79_v16 = vmul.f32 %v124_v15, %v77_v14  ;;  %vm84_vm1 = vweird.f32 %v124_v15 }
  0xa8   :  { %vm85_vm3 = vmor %vm83_vm2, %vm84_vm1 }
  0xa9   :  { %v80_v17 = vsub.f32 1.0, %v79_v16 }
  0xab   :  { %v81_v19 = vmul.f32 %v124_v15, %v80_v17 }
  0xad   :  { %v82_v21 = vadd.f32 %v124_v15, %v81_v19 }
  0xaf   :  { %v86_v23 = vsel %vm85_vm3, %v124_v15, %v82_v21 }
  0xb0   :  { %v91_v25 = vsel %vm88_vm5, %v90_v22, %v86_v23 }
  0xb1   :  { %v92_v26 = vmul.f32 %v91_v25, %v76_v24 }
  0xb3   :  { %94 = vst.msk [vmem:[%s169_s3] sm:$0x3] %vm93_vm6, %v92_v26 }

</bundles_post_ra>
